<compile_context>
chip_gen: v7x
topology: tpu7x:2x2x1
jax: 0.10.0
libtpu: 0.0.40
codegen_flags: <defaults>
</compile_context>

<pallas_src>
import jax
import jax.numpy as jnp
from jax.experimental import pallas as pl
from jax.experimental.pallas import tpu as pltpu

IN_F = 7
HID = 4
OUT_F = 4

# Packed flat parameter layout (row-major):
#   [0:28)  w1 (7,4)   -> index k*HID + c
#   [28:32) b1 (4,)
#   [32:48) w2 (4,4)   -> index j*OUT_F + c
#   [48:52) b2 (4,)
W1_OFF = 0
B1_OFF = W1_OFF + IN_F * HID        # 28
W2_OFF = B1_OFF + HID               # 32
B2_OFF = W2_OFF + HID * OUT_F       # 48
PARAM_COUNT = B2_OFF + OUT_F        # 52

TILE_B = 32768                      # batch (lane-axis) tile per grid step


def mlp_kernel(p_ref, x_ref, o_ref):
    """p: SMEM (52,) f32 packed [w1; b1; w2; b2],
    x: VMEM (7, TB) f32 (batch on lanes), o: VMEM (4, TB) f32."""
    # Layer 1: h[c, :] = relu(b1[c] + sum_k w1[k, c] * x[k, :])
    # (scalar-from-SMEM * lane-dense vector MACs on the VPU; MXU skipped on purpose)
    h = []
    for c in range(HID):
        acc = p_ref[B1_OFF + c] + p_ref[W1_OFF + c] * x_ref[0:1, :]
        for k in range(1, IN_F):
            acc = acc + p_ref[W1_OFF + k * HID + c] * x_ref[k:k + 1, :]
        h.append(jnp.maximum(acc, 0.0))

    # Layer 2: y[c, :] = b2[c] + sum_j w2[j, c] * h[j, :]
    for c in range(OUT_F):
        acc = p_ref[B2_OFF + c] + p_ref[W2_OFF + c] * h[0]
        for j in range(1, HID):
            acc = acc + p_ref[W2_OFF + j * OUT_F + c] * h[j]
        o_ref[c:c + 1, :] = acc.astype(o_ref.dtype)


def mlp_forward(xt, params, tile_b=TILE_B):
    """xt: (7, B) f32 (batch on lanes), params: (52,) f32 -> (4, B) f32."""
    B = xt.shape[1]
    # Small B: one full-array block (block dims == array dims, so no (8,128) rule).
    # Large B: lane tile of tile_b (multiple of 128); cdiv grid handles ragged tails.
    tile = tile_b if B >= tile_b else B
    grid = (pl.cdiv(B, tile),)

    return pl.pallas_call(
        mlp_kernel,
        out_shape=jax.ShapeDtypeStruct((OUT_F, B), jnp.float32),
        grid=grid,
        in_specs=[
            # Whole packed parameter slab, grid-invariant, resident in SMEM.
            pl.BlockSpec(memory_space=pltpu.MemorySpace.SMEM),
            pl.BlockSpec((IN_F, tile), lambda i: (0, i)),
        ],
        out_specs=pl.BlockSpec((OUT_F, tile), lambda i: (0, i)),
        compiler_params=pltpu.CompilerParams(
            dimension_semantics=("parallel",)),
        cost_estimate=pl.CostEstimate(
            flops=2 * B * (IN_F * HID + HID * OUT_F),
            transcendentals=0,
            bytes_accessed=(IN_F + OUT_F) * B * 4 + PARAM_COUNT * 4),
    )(params, xt)


class PallasModel:
    """JAX/Pallas equivalent of the PyTorch Model (Linear(7,4) -> ReLU -> Linear(4,4))."""

    def __init__(self, key):
        k1, k2, k3, k4 = jax.random.split(key, 4)
        # nn.Linear-style uniform(-1/sqrt(fan_in), 1/sqrt(fan_in)) init.
        bound1 = 1.0 / jnp.sqrt(7.0)
        bound2 = 1.0 / jnp.sqrt(4.0)
        # Stored as (in_features, out_features) so the math is x @ W (+ b).
        self.w1 = jax.random.uniform(k1, (IN_F, HID), jnp.float32, -bound1, bound1)
        self.b1 = jax.random.uniform(k2, (HID,), jnp.float32, -bound1, bound1)
        self.w2 = jax.random.uniform(k3, (HID, OUT_F), jnp.float32, -bound2, bound2)
        self.b2 = jax.random.uniform(k4, (OUT_F,), jnp.float32, -bound2, bound2)
        # Single flat packed slab -> one SMEM-resident parameter input.
        self.params = jnp.concatenate([
            self.w1.reshape(-1), self.b1.reshape(-1),
            self.w2.reshape(-1), self.b2.reshape(-1)])  # (52,)

    def __call__(self, x):
        # x: (d0, d1, 7) -> flatten(0,1) -> (B, 7); transpose so batch is lane-dense.
        B = x.shape[0] * x.shape[1]
        x2 = x.reshape(B, x.shape[2]).astype(jnp.float32)
        yt = mlp_forward(x2.T, self.params)   # (4, B)
        # Transpose back to the spec's (B, 4); flatten(start_dim=1) is a no-op on 2-D.
        return yt.T


def reference_forward(model, x):
    """Pure-JAX reference for correctness checking."""
    B = x.shape[0] * x.shape[1]
    x2 = x.reshape(B, x.shape[2]).astype(jnp.float32)
    h = jnp.maximum(x2 @ model.w1 + model.b1, 0.0)
    return h @ model.w2 + model.b2


if __name__ == "__main__":
    key = jax.random.PRNGKey(0)
    k_model, k1, k2, k3 = jax.random.split(key, 4)

    model = PallasModel(k_model)

    # 1) Spec-sized input (B = 1): single full-array block.
    x_small = jax.random.normal(k1, (1, 1, 7), dtype=jnp.float32)
    out_small = jax.block_until_ready(model(x_small))
    ref_small = reference_forward(model, x_small)
    assert out_small.shape == (1, 4), out_small.shape
    assert jnp.allclose(out_small, ref_small, atol=1e-5, rtol=1e-5)

    # 2) Larger batch (B = 512): lane-dense single block (B < TILE_B).
    x_mid = jax.random.normal(k2, (2, 256, 7), dtype=jnp.float32)
    out_mid = jax.block_until_ready(model(x_mid))
    ref_mid = reference_forward(model, x_mid)
    assert out_mid.shape == (512, 4), out_mid.shape
    assert jnp.allclose(out_mid, ref_mid, atol=1e-5, rtol=1e-5)

    # 3) Gridded + ragged-tail path, exercised with a small tile override
    #    (B = 400, tile = 128 -> grid = 4 with a partial last block).
    x_tail = jax.random.normal(k3, (4, 100, 7), dtype=jnp.float32)
    B_tail = 400
    xt_tail = x_tail.reshape(B_tail, IN_F).astype(jnp.float32).T
    out_tail = jax.block_until_ready(mlp_forward(xt_tail, model.params, tile_b=128).T)
    ref_tail = reference_forward(model, x_tail)
    assert out_tail.shape == (400, 4), out_tail.shape
    assert jnp.allclose(out_tail, ref_tail, atol=1e-5, rtol=1e-5)

    print("KERNEL_OK")
</pallas_src>

<mosaic_0001>
module attributes {stable_mosaic.version = 11 : i64} {
  func.func @mlp_kernel(%arg0: i32, %arg1: memref<52xf32, #tpu.memory_space<smem>>, %arg2: memref<7x1xf32, #tpu.memory_space<vmem>>, %arg3: memref<4x1xf32, #tpu.memory_space<vmem>>) attributes {dimension_semantics = [#tpu.dimension_semantics<parallel>], iteration_bounds = array<i64: 1>, scalar_prefetch = 0 : i64, scratch_operands = 0 : i64, tpu.core_type = #tpu.core_type<tc>, window_params = [{transform_indices = @transform_0, window_bounds = array<i64: 52>}, {transform_indices = @transform_1, window_bounds = array<i64: 7, 1>}, {transform_indices = @transform_2, window_bounds = array<i64: 4, 1>}]} {
    %c28 = arith.constant 28 : index
    %0 = memref.load %arg1[%c28] : memref<52xf32, #tpu.memory_space<smem>>
    %c0 = arith.constant 0 : index
    %1 = memref.load %arg1[%c0] : memref<52xf32, #tpu.memory_space<smem>>
    %c0_0 = arith.constant 0 : index
    %c0_1 = arith.constant 0 : index
    %2 = vector.load %arg2[%c0_0, %c0_1] : memref<7x1xf32, #tpu.memory_space<vmem>>, vector<1x1xf32>
    %3 = vector.broadcast %1 : f32 to vector<1x1xf32>
    %4 = arith.mulf %3, %2 : vector<1x1xf32>
    %5 = vector.broadcast %0 : f32 to vector<1x1xf32>
    %6 = arith.addf %5, %4 : vector<1x1xf32>
    %c4 = arith.constant 4 : index
    %7 = memref.load %arg1[%c4] : memref<52xf32, #tpu.memory_space<smem>>
    %c1 = arith.constant 1 : index
    %c0_2 = arith.constant 0 : index
    %8 = vector.load %arg2[%c1, %c0_2] : memref<7x1xf32, #tpu.memory_space<vmem>>, vector<1x1xf32>
    %9 = vector.broadcast %7 : f32 to vector<1x1xf32>
    %10 = arith.mulf %9, %8 : vector<1x1xf32>
    %11 = arith.addf %6, %10 : vector<1x1xf32>
    %c8 = arith.constant 8 : index
    %12 = memref.load %arg1[%c8] : memref<52xf32, #tpu.memory_space<smem>>
    %c2 = arith.constant 2 : index
    %c0_3 = arith.constant 0 : index
    %13 = vector.load %arg2[%c2, %c0_3] : memref<7x1xf32, #tpu.memory_space<vmem>>, vector<1x1xf32>
    %14 = vector.broadcast %12 : f32 to vector<1x1xf32>
    %15 = arith.mulf %14, %13 : vector<1x1xf32>
    %16 = arith.addf %11, %15 : vector<1x1xf32>
    %c12 = arith.constant 12 : index
    %17 = memref.load %arg1[%c12] : memref<52xf32, #tpu.memory_space<smem>>
    %c3 = arith.constant 3 : index
    %c0_4 = arith.constant 0 : index
    %18 = vector.load %arg2[%c3, %c0_4] : memref<7x1xf32, #tpu.memory_space<vmem>>, vector<1x1xf32>
    %19 = vector.broadcast %17 : f32 to vector<1x1xf32>
    %20 = arith.mulf %19, %18 : vector<1x1xf32>
    %21 = arith.addf %16, %20 : vector<1x1xf32>
    %c16 = arith.constant 16 : index
    %22 = memref.load %arg1[%c16] : memref<52xf32, #tpu.memory_space<smem>>
    %c4_5 = arith.constant 4 : index
    %c0_6 = arith.constant 0 : index
    %23 = vector.load %arg2[%c4_5, %c0_6] : memref<7x1xf32, #tpu.memory_space<vmem>>, vector<1x1xf32>
    %24 = vector.broadcast %22 : f32 to vector<1x1xf32>
    %25 = arith.mulf %24, %23 : vector<1x1xf32>
    %26 = arith.addf %21, %25 : vector<1x1xf32>
    %c20 = arith.constant 20 : index
    %27 = memref.load %arg1[%c20] : memref<52xf32, #tpu.memory_space<smem>>
    %c5 = arith.constant 5 : index
    %c0_7 = arith.constant 0 : index
    %28 = vector.load %arg2[%c5, %c0_7] : memref<7x1xf32, #tpu.memory_space<vmem>>, vector<1x1xf32>
    %29 = vector.broadcast %27 : f32 to vector<1x1xf32>
    %30 = arith.mulf %29, %28 : vector<1x1xf32>
    %31 = arith.addf %26, %30 : vector<1x1xf32>
    %c24 = arith.constant 24 : index
    %32 = memref.load %arg1[%c24] : memref<52xf32, #tpu.memory_space<smem>>
    %c6 = arith.constant 6 : index
    %c0_8 = arith.constant 0 : index
    %33 = vector.load %arg2[%c6, %c0_8] : memref<7x1xf32, #tpu.memory_space<vmem>>, vector<1x1xf32>
    %34 = vector.broadcast %32 : f32 to vector<1x1xf32>
    %35 = arith.mulf %34, %33 : vector<1x1xf32>
    %36 = arith.addf %31, %35 : vector<1x1xf32>
    %cst = arith.constant 0.000000e+00 : f32
    %37 = vector.broadcast %cst : f32 to vector<1x1xf32>
    %38 = arith.maximumf %36, %37 : vector<1x1xf32>
    %c29 = arith.constant 29 : index
    %39 = memref.load %arg1[%c29] : memref<52xf32, #tpu.memory_space<smem>>
    %c1_9 = arith.constant 1 : index
    %40 = memref.load %arg1[%c1_9] : memref<52xf32, #tpu.memory_space<smem>>
    %c0_10 = arith.constant 0 : index
    %c0_11 = arith.constant 0 : index
    %41 = vector.load %arg2[%c0_10, %c0_11] : memref<7x1xf32, #tpu.memory_space<vmem>>, vector<1x1xf32>
    %42 = vector.broadcast %40 : f32 to vector<1x1xf32>
    %43 = arith.mulf %42, %41 : vector<1x1xf32>
    %44 = vector.broadcast %39 : f32 to vector<1x1xf32>
    %45 = arith.addf %44, %43 : vector<1x1xf32>
    %c5_12 = arith.constant 5 : index
    %46 = memref.load %arg1[%c5_12] : memref<52xf32, #tpu.memory_space<smem>>
    %c1_13 = arith.constant 1 : index
    %c0_14 = arith.constant 0 : index
    %47 = vector.load %arg2[%c1_13, %c0_14] : memref<7x1xf32, #tpu.memory_space<vmem>>, vector<1x1xf32>
    %48 = vector.broadcast %46 : f32 to vector<1x1xf32>
    %49 = arith.mulf %48, %47 : vector<1x1xf32>
    %50 = arith.addf %45, %49 : vector<1x1xf32>
    %c9 = arith.constant 9 : index
    %51 = memref.load %arg1[%c9] : memref<52xf32, #tpu.memory_space<smem>>
    %c2_15 = arith.constant 2 : index
    %c0_16 = arith.constant 0 : index
    %52 = vector.load %arg2[%c2_15, %c0_16] : memref<7x1xf32, #tpu.memory_space<vmem>>, vector<1x1xf32>
    %53 = vector.broadcast %51 : f32 to vector<1x1xf32>
    %54 = arith.mulf %53, %52 : vector<1x1xf32>
    %55 = arith.addf %50, %54 : vector<1x1xf32>
    %c13 = arith.constant 13 : index
    %56 = memref.load %arg1[%c13] : memref<52xf32, #tpu.memory_space<smem>>
    %c3_17 = arith.constant 3 : index
    %c0_18 = arith.constant 0 : index
    %57 = vector.load %arg2[%c3_17, %c0_18] : memref<7x1xf32, #tpu.memory_space<vmem>>, vector<1x1xf32>
    %58 = vector.broadcast %56 : f32 to vector<1x1xf32>
    %59 = arith.mulf %58, %57 : vector<1x1xf32>
    %60 = arith.addf %55, %59 : vector<1x1xf32>
    %c17 = arith.constant 17 : index
    %61 = memref.load %arg1[%c17] : memref<52xf32, #tpu.memory_space<smem>>
    %c4_19 = arith.constant 4 : index
    %c0_20 = arith.constant 0 : index
    %62 = vector.load %arg2[%c4_19, %c0_20] : memref<7x1xf32, #tpu.memory_space<vmem>>, vector<1x1xf32>
    %63 = vector.broadcast %61 : f32 to vector<1x1xf32>
    %64 = arith.mulf %63, %62 : vector<1x1xf32>
    %65 = arith.addf %60, %64 : vector<1x1xf32>
    %c21 = arith.constant 21 : index
    %66 = memref.load %arg1[%c21] : memref<52xf32, #tpu.memory_space<smem>>
    %c5_21 = arith.constant 5 : index
    %c0_22 = arith.constant 0 : index
    %67 = vector.load %arg2[%c5_21, %c0_22] : memref<7x1xf32, #tpu.memory_space<vmem>>, vector<1x1xf32>
    %68 = vector.broadcast %66 : f32 to vector<1x1xf32>
    %69 = arith.mulf %68, %67 : vector<1x1xf32>
    %70 = arith.addf %65, %69 : vector<1x1xf32>
    %c25 = arith.constant 25 : index
    %71 = memref.load %arg1[%c25] : memref<52xf32, #tpu.memory_space<smem>>
    %c6_23 = arith.constant 6 : index
    %c0_24 = arith.constant 0 : index
    %72 = vector.load %arg2[%c6_23, %c0_24] : memref<7x1xf32, #tpu.memory_space<vmem>>, vector<1x1xf32>
    %73 = vector.broadcast %71 : f32 to vector<1x1xf32>
    %74 = arith.mulf %73, %72 : vector<1x1xf32>
    %75 = arith.addf %70, %74 : vector<1x1xf32>
    %cst_25 = arith.constant 0.000000e+00 : f32
    %76 = vector.broadcast %cst_25 : f32 to vector<1x1xf32>
    %77 = arith.maximumf %75, %76 : vector<1x1xf32>
    %c30 = arith.constant 30 : index
    %78 = memref.load %arg1[%c30] : memref<52xf32, #tpu.memory_space<smem>>
    %c2_26 = arith.constant 2 : index
    %79 = memref.load %arg1[%c2_26] : memref<52xf32, #tpu.memory_space<smem>>
    %c0_27 = arith.constant 0 : index
    %c0_28 = arith.constant 0 : index
    %80 = vector.load %arg2[%c0_27, %c0_28] : memref<7x1xf32, #tpu.memory_space<vmem>>, vector<1x1xf32>
    %81 = vector.broadcast %79 : f32 to vector<1x1xf32>
    %82 = arith.mulf %81, %80 : vector<1x1xf32>
    %83 = vector.broadcast %78 : f32 to vector<1x1xf32>
    %84 = arith.addf %83, %82 : vector<1x1xf32>
    %c6_29 = arith.constant 6 : index
    %85 = memref.load %arg1[%c6_29] : memref<52xf32, #tpu.memory_space<smem>>
    %c1_30 = arith.constant 1 : index
    %c0_31 = arith.constant 0 : index
    %86 = vector.load %arg2[%c1_30, %c0_31] : memref<7x1xf32, #tpu.memory_space<vmem>>, vector<1x1xf32>
    %87 = vector.broadcast %85 : f32 to vector<1x1xf32>
    %88 = arith.mulf %87, %86 : vector<1x1xf32>
    %89 = arith.addf %84, %88 : vector<1x1xf32>
    %c10 = arith.constant 10 : index
    %90 = memref.load %arg1[%c10] : memref<52xf32, #tpu.memory_space<smem>>
    %c2_32 = arith.constant 2 : index
    %c0_33 = arith.constant 0 : index
    %91 = vector.load %arg2[%c2_32, %c0_33] : memref<7x1xf32, #tpu.memory_space<vmem>>, vector<1x1xf32>
    %92 = vector.broadcast %90 : f32 to vector<1x1xf32>
    %93 = arith.mulf %92, %91 : vector<1x1xf32>
    %94 = arith.addf %89, %93 : vector<1x1xf32>
    %c14 = arith.constant 14 : index
    %95 = memref.load %arg1[%c14] : memref<52xf32, #tpu.memory_space<smem>>
    %c3_34 = arith.constant 3 : index
    %c0_35 = arith.constant 0 : index
    %96 = vector.load %arg2[%c3_34, %c0_35] : memref<7x1xf32, #tpu.memory_space<vmem>>, vector<1x1xf32>
    %97 = vector.broadcast %95 : f32 to vector<1x1xf32>
    %98 = arith.mulf %97, %96 : vector<1x1xf32>
    %99 = arith.addf %94, %98 : vector<1x1xf32>
    %c18 = arith.constant 18 : index
    %100 = memref.load %arg1[%c18] : memref<52xf32, #tpu.memory_space<smem>>
    %c4_36 = arith.constant 4 : index
    %c0_37 = arith.constant 0 : index
    %101 = vector.load %arg2[%c4_36, %c0_37] : memref<7x1xf32, #tpu.memory_space<vmem>>, vector<1x1xf32>
    %102 = vector.broadcast %100 : f32 to vector<1x1xf32>
    %103 = arith.mulf %102, %101 : vector<1x1xf32>
    %104 = arith.addf %99, %103 : vector<1x1xf32>
    %c22 = arith.constant 22 : index
    %105 = memref.load %arg1[%c22] : memref<52xf32, #tpu.memory_space<smem>>
    %c5_38 = arith.constant 5 : index
    %c0_39 = arith.constant 0 : index
    %106 = vector.load %arg2[%c5_38, %c0_39] : memref<7x1xf32, #tpu.memory_space<vmem>>, vector<1x1xf32>
    %107 = vector.broadcast %105 : f32 to vector<1x1xf32>
    %108 = arith.mulf %107, %106 : vector<1x1xf32>
    %109 = arith.addf %104, %108 : vector<1x1xf32>
    %c26 = arith.constant 26 : index
    %110 = memref.load %arg1[%c26] : memref<52xf32, #tpu.memory_space<smem>>
    %c6_40 = arith.constant 6 : index
    %c0_41 = arith.constant 0 : index
    %111 = vector.load %arg2[%c6_40, %c0_41] : memref<7x1xf32, #tpu.memory_space<vmem>>, vector<1x1xf32>
    %112 = vector.broadcast %110 : f32 to vector<1x1xf32>
    %113 = arith.mulf %112, %111 : vector<1x1xf32>
    %114 = arith.addf %109, %113 : vector<1x1xf32>
    %cst_42 = arith.constant 0.000000e+00 : f32
    %115 = vector.broadcast %cst_42 : f32 to vector<1x1xf32>
    %116 = arith.maximumf %114, %115 : vector<1x1xf32>
    %c31 = arith.constant 31 : index
    %117 = memref.load %arg1[%c31] : memref<52xf32, #tpu.memory_space<smem>>
    %c3_43 = arith.constant 3 : index
    %118 = memref.load %arg1[%c3_43] : memref<52xf32, #tpu.memory_space<smem>>
    %c0_44 = arith.constant 0 : index
    %c0_45 = arith.constant 0 : index
    %119 = vector.load %arg2[%c0_44, %c0_45] : memref<7x1xf32, #tpu.memory_space<vmem>>, vector<1x1xf32>
    %120 = vector.broadcast %118 : f32 to vector<1x1xf32>
    %121 = arith.mulf %120, %119 : vector<1x1xf32>
    %122 = vector.broadcast %117 : f32 to vector<1x1xf32>
    %123 = arith.addf %122, %121 : vector<1x1xf32>
    %c7 = arith.constant 7 : index
    %124 = memref.load %arg1[%c7] : memref<52xf32, #tpu.memory_space<smem>>
    %c1_46 = arith.constant 1 : index
    %c0_47 = arith.constant 0 : index
    %125 = vector.load %arg2[%c1_46, %c0_47] : memref<7x1xf32, #tpu.memory_space<vmem>>, vector<1x1xf32>
    %126 = vector.broadcast %124 : f32 to vector<1x1xf32>
    %127 = arith.mulf %126, %125 : vector<1x1xf32>
    %128 = arith.addf %123, %127 : vector<1x1xf32>
    %c11 = arith.constant 11 : index
    %129 = memref.load %arg1[%c11] : memref<52xf32, #tpu.memory_space<smem>>
    %c2_48 = arith.constant 2 : index
    %c0_49 = arith.constant 0 : index
    %130 = vector.load %arg2[%c2_48, %c0_49] : memref<7x1xf32, #tpu.memory_space<vmem>>, vector<1x1xf32>
    %131 = vector.broadcast %129 : f32 to vector<1x1xf32>
    %132 = arith.mulf %131, %130 : vector<1x1xf32>
    %133 = arith.addf %128, %132 : vector<1x1xf32>
    %c15 = arith.constant 15 : index
    %134 = memref.load %arg1[%c15] : memref<52xf32, #tpu.memory_space<smem>>
    %c3_50 = arith.constant 3 : index
    %c0_51 = arith.constant 0 : index
    %135 = vector.load %arg2[%c3_50, %c0_51] : memref<7x1xf32, #tpu.memory_space<vmem>>, vector<1x1xf32>
    %136 = vector.broadcast %134 : f32 to vector<1x1xf32>
    %137 = arith.mulf %136, %135 : vector<1x1xf32>
    %138 = arith.addf %133, %137 : vector<1x1xf32>
    %c19 = arith.constant 19 : index
    %139 = memref.load %arg1[%c19] : memref<52xf32, #tpu.memory_space<smem>>
    %c4_52 = arith.constant 4 : index
    %c0_53 = arith.constant 0 : index
    %140 = vector.load %arg2[%c4_52, %c0_53] : memref<7x1xf32, #tpu.memory_space<vmem>>, vector<1x1xf32>
    %141 = vector.broadcast %139 : f32 to vector<1x1xf32>
    %142 = arith.mulf %141, %140 : vector<1x1xf32>
    %143 = arith.addf %138, %142 : vector<1x1xf32>
    %c23 = arith.constant 23 : index
    %144 = memref.load %arg1[%c23] : memref<52xf32, #tpu.memory_space<smem>>
    %c5_54 = arith.constant 5 : index
    %c0_55 = arith.constant 0 : index
    %145 = vector.load %arg2[%c5_54, %c0_55] : memref<7x1xf32, #tpu.memory_space<vmem>>, vector<1x1xf32>
    %146 = vector.broadcast %144 : f32 to vector<1x1xf32>
    %147 = arith.mulf %146, %145 : vector<1x1xf32>
    %148 = arith.addf %143, %147 : vector<1x1xf32>
    %c27 = arith.constant 27 : index
    %149 = memref.load %arg1[%c27] : memref<52xf32, #tpu.memory_space<smem>>
    %c6_56 = arith.constant 6 : index
    %c0_57 = arith.constant 0 : index
    %150 = vector.load %arg2[%c6_56, %c0_57] : memref<7x1xf32, #tpu.memory_space<vmem>>, vector<1x1xf32>
    %151 = vector.broadcast %149 : f32 to vector<1x1xf32>
    %152 = arith.mulf %151, %150 : vector<1x1xf32>
    %153 = arith.addf %148, %152 : vector<1x1xf32>
    %cst_58 = arith.constant 0.000000e+00 : f32
    %154 = vector.broadcast %cst_58 : f32 to vector<1x1xf32>
    %155 = arith.maximumf %153, %154 : vector<1x1xf32>
    %c48 = arith.constant 48 : index
    %156 = memref.load %arg1[%c48] : memref<52xf32, #tpu.memory_space<smem>>
    %c32 = arith.constant 32 : index
    %157 = memref.load %arg1[%c32] : memref<52xf32, #tpu.memory_space<smem>>
    %158 = vector.broadcast %157 : f32 to vector<1x1xf32>
    %159 = arith.mulf %158, %38 : vector<1x1xf32>
    %160 = vector.broadcast %156 : f32 to vector<1x1xf32>
    %161 = arith.addf %160, %159 : vector<1x1xf32>
    %c36 = arith.constant 36 : index
    %162 = memref.load %arg1[%c36] : memref<52xf32, #tpu.memory_space<smem>>
    %163 = vector.broadcast %162 : f32 to vector<1x1xf32>
    %164 = arith.mulf %163, %77 : vector<1x1xf32>
    %165 = arith.addf %161, %164 : vector<1x1xf32>
    %c40 = arith.constant 40 : index
    %166 = memref.load %arg1[%c40] : memref<52xf32, #tpu.memory_space<smem>>
    %167 = vector.broadcast %166 : f32 to vector<1x1xf32>
    %168 = arith.mulf %167, %116 : vector<1x1xf32>
    %169 = arith.addf %165, %168 : vector<1x1xf32>
    %c44 = arith.constant 44 : index
    %170 = memref.load %arg1[%c44] : memref<52xf32, #tpu.memory_space<smem>>
    %171 = vector.broadcast %170 : f32 to vector<1x1xf32>
    %172 = arith.mulf %171, %155 : vector<1x1xf32>
    %173 = arith.addf %169, %172 : vector<1x1xf32>
    %c0_59 = arith.constant 0 : index
    %c0_60 = arith.constant 0 : index
    %174 = vector.load %arg3[%c0_59, %c0_60] : memref<4x1xf32, #tpu.memory_space<vmem>>, vector<1x1xf32>
    tpu.vector_store %arg3[%c0_59, %c0_60], %173 {strides = array<i32>} : memref<4x1xf32, #tpu.memory_space<vmem>>, vector<1x1xf32>,
    %c49 = arith.constant 49 : index
    %175 = memref.load %arg1[%c49] : memref<52xf32, #tpu.memory_space<smem>>
    %c33 = arith.constant 33 : index
    %176 = memref.load %arg1[%c33] : memref<52xf32, #tpu.memory_space<smem>>
    %177 = vector.broadcast %176 : f32 to vector<1x1xf32>
    %178 = arith.mulf %177, %38 : vector<1x1xf32>
    %179 = vector.broadcast %175 : f32 to vector<1x1xf32>
    %180 = arith.addf %179, %178 : vector<1x1xf32>
    %c37 = arith.constant 37 : index
    %181 = memref.load %arg1[%c37] : memref<52xf32, #tpu.memory_space<smem>>
    %182 = vector.broadcast %181 : f32 to vector<1x1xf32>
    %183 = arith.mulf %182, %77 : vector<1x1xf32>
    %184 = arith.addf %180, %183 : vector<1x1xf32>
    %c41 = arith.constant 41 : index
    %185 = memref.load %arg1[%c41] : memref<52xf32, #tpu.memory_space<smem>>
    %186 = vector.broadcast %185 : f32 to vector<1x1xf32>
    %187 = arith.mulf %186, %116 : vector<1x1xf32>
    %188 = arith.addf %184, %187 : vector<1x1xf32>
    %c45 = arith.constant 45 : index
    %189 = memref.load %arg1[%c45] : memref<52xf32, #tpu.memory_space<smem>>
    %190 = vector.broadcast %189 : f32 to vector<1x1xf32>
    %191 = arith.mulf %190, %155 : vector<1x1xf32>
    %192 = arith.addf %188, %191 : vector<1x1xf32>
    %c1_61 = arith.constant 1 : index
    %c0_62 = arith.constant 0 : index
    %193 = vector.load %arg3[%c1_61, %c0_62] : memref<4x1xf32, #tpu.memory_space<vmem>>, vector<1x1xf32>
    tpu.vector_store %arg3[%c1_61, %c0_62], %192 {strides = array<i32>} : memref<4x1xf32, #tpu.memory_space<vmem>>, vector<1x1xf32>,
    %c50 = arith.constant 50 : index
    %194 = memref.load %arg1[%c50] : memref<52xf32, #tpu.memory_space<smem>>
    %c34 = arith.constant 34 : index
    %195 = memref.load %arg1[%c34] : memref<52xf32, #tpu.memory_space<smem>>
    %196 = vector.broadcast %195 : f32 to vector<1x1xf32>
    %197 = arith.mulf %196, %38 : vector<1x1xf32>
    %198 = vector.broadcast %194 : f32 to vector<1x1xf32>
    %199 = arith.addf %198, %197 : vector<1x1xf32>
    %c38 = arith.constant 38 : index
    %200 = memref.load %arg1[%c38] : memref<52xf32, #tpu.memory_space<smem>>
    %201 = vector.broadcast %200 : f32 to vector<1x1xf32>
    %202 = arith.mulf %201, %77 : vector<1x1xf32>
    %203 = arith.addf %199, %202 : vector<1x1xf32>
    %c42 = arith.constant 42 : index
    %204 = memref.load %arg1[%c42] : memref<52xf32, #tpu.memory_space<smem>>
    %205 = vector.broadcast %204 : f32 to vector<1x1xf32>
    %206 = arith.mulf %205, %116 : vector<1x1xf32>
    %207 = arith.addf %203, %206 : vector<1x1xf32>
    %c46 = arith.constant 46 : index
    %208 = memref.load %arg1[%c46] : memref<52xf32, #tpu.memory_space<smem>>
    %209 = vector.broadcast %208 : f32 to vector<1x1xf32>
    %210 = arith.mulf %209, %155 : vector<1x1xf32>
    %211 = arith.addf %207, %210 : vector<1x1xf32>
    %c2_63 = arith.constant 2 : index
    %c0_64 = arith.constant 0 : index
    %212 = vector.load %arg3[%c2_63, %c0_64] : memref<4x1xf32, #tpu.memory_space<vmem>>, vector<1x1xf32>
    tpu.vector_store %arg3[%c2_63, %c0_64], %211 {strides = array<i32>} : memref<4x1xf32, #tpu.memory_space<vmem>>, vector<1x1xf32>,
    %c51 = arith.constant 51 : index
    %213 = memref.load %arg1[%c51] : memref<52xf32, #tpu.memory_space<smem>>
    %c35 = arith.constant 35 : index
    %214 = memref.load %arg1[%c35] : memref<52xf32, #tpu.memory_space<smem>>
    %215 = vector.broadcast %214 : f32 to vector<1x1xf32>
    %216 = arith.mulf %215, %38 : vector<1x1xf32>
    %217 = vector.broadcast %213 : f32 to vector<1x1xf32>
    %218 = arith.addf %217, %216 : vector<1x1xf32>
    %c39 = arith.constant 39 : index
    %219 = memref.load %arg1[%c39] : memref<52xf32, #tpu.memory_space<smem>>
    %220 = vector.broadcast %219 : f32 to vector<1x1xf32>
    %221 = arith.mulf %220, %77 : vector<1x1xf32>
    %222 = arith.addf %218, %221 : vector<1x1xf32>
    %c43 = arith.constant 43 : index
    %223 = memref.load %arg1[%c43] : memref<52xf32, #tpu.memory_space<smem>>
    %224 = vector.broadcast %223 : f32 to vector<1x1xf32>
    %225 = arith.mulf %224, %116 : vector<1x1xf32>
    %226 = arith.addf %222, %225 : vector<1x1xf32>
    %c47 = arith.constant 47 : index
    %227 = memref.load %arg1[%c47] : memref<52xf32, #tpu.memory_space<smem>>
    %228 = vector.broadcast %227 : f32 to vector<1x1xf32>
    %229 = arith.mulf %228, %155 : vector<1x1xf32>
    %230 = arith.addf %226, %229 : vector<1x1xf32>
    %c3_65 = arith.constant 3 : index
    %c0_66 = arith.constant 0 : index
    %231 = vector.load %arg3[%c3_65, %c0_66] : memref<4x1xf32, #tpu.memory_space<vmem>>, vector<1x1xf32>
    tpu.vector_store %arg3[%c3_65, %c0_66], %230 {strides = array<i32>} : memref<4x1xf32, #tpu.memory_space<vmem>>, vector<1x1xf32>,
    return
  }
  func.func @transform_0(%arg0: i32) -> i32 {
    %c0_i32 = arith.constant 0 : i32
    %c0_i32_0 = arith.constant 0 : i32
    return %c0_i32 : i32
  }
  func.func @transform_1(%arg0: i32) -> (i32, i32) {
    %c0_i32 = arith.constant 0 : i32
    %c0_i32_0 = arith.constant 0 : i32
    return %c0_i32, %arg0 : i32, i32
  }
  func.func @transform_2(%arg0: i32) -> (i32, i32) {
    %c0_i32 = arith.constant 0 : i32
    %c0_i32_0 = arith.constant 0 : i32
    return %c0_i32, %arg0 : i32, i32
  }
}

</mosaic_0001>

<bundles_post_ra>
// kernel: tpu_custom_call.1
= control target key start
LH: loop header
LB: loop body
LE: loop exit
PB: predicated region body
PF: predicated region fallthrough
CT: control target
= control target key end

     0   :  { %7 = vsyncpa [#allocation3], 0  ;;  %s547_s0 = inlined_call_operand.vmem [shape: f32[52], index: 0, kind: input, shape index: {}]   ;;  %s548_s1 = inlined_call_operand.vmem [shape: f32[7,1], index: 1, kind: input, shape index: {}]   ;;  %s549_s2 = inlined_call_operand.vmem [shape: f32[4,1], index: 2, kind: output, shape index: {}]  }
   0x1   :  { %s14_s11 = sshll.u32 %s547_s0, 4  ;;  %s15_s11 = int_to_ptr.vmem [resolvable:$true] %s14_s11 }
   0x2   :  { %s289_s12 = scalar_lea.vmem %s15_s11, 16  ;;  %p294_p1 = scmp.lt.s32.totalorder %s15_s11, %s15_s11 }
   0x3   :  { %p290_p0 = scmp.ne.s32.totalorder %s15_s11, %s289_s12  ;;  %p295_p2 = scmp.lt.s32.totalorder %s289_s12, %s289_s12 }
   0x5   :  { %p296_p3 = por %p295_p2, %p294_p1 }
   0x7   :  { %p297_p4 = pnand %p296_p3, %p290_p0 }
   0x9   :  { %300 = shalt.err (!%p297_p4)
}
   0xa   :  { %s303_s13 = smov [#allocation2]  }
   0xb   :  { %17 = dma.vmem_to_smem %s15_s11, 16, %s303_s13, [#allocation3]  }
   0xc   :  { %301 = dma.done.wait [#allocation3], 16  }
   0xd   :  { %302 = vsyncadd [#allocation3], 4294967280 }
   0xe   :  { %23 = sfence }
   0xf   :  { %s237_s14 = sld [smem:[#allocation2 + $0x1c]]  ;;  %s25_s15 = sld [smem:[#allocation2]]  ;;  %v331_v0 = vld [vmem:[%s548_s1] sm:$0x1]  ;;  %v336_v1 = vld [vmem:[%s548_s1 + $0x1] sm:$0x1] }
  0x10   :  { %s238_s16 = sld [smem:[#allocation2 + $0x4]]  ;;  %s239_s17 = sld [smem:[#allocation2 + $0x8]]  ;;  %v343_v2 = vld [vmem:[%s548_s1 + $0x2] sm:$0x1]  ;;  %v352_v5 = vld [vmem:[%s548_s1 + $0x3] sm:$0x1] }
  0x11   :  { %s322_s18 = sld [smem:[#allocation2 + $0xc]]  ;;  %s324_s0 = sld [smem:[#allocation2 + $0x10]]  ;;  %v362_v9 = vld [vmem:[%s548_s1 + $0x4] sm:$0x1]  ;;  %v373_v12 = vld [vmem:[%s548_s1 + $0x5] sm:$0x1] }
  0x12   :  { %s326_s19 = sld [smem:[#allocation2 + $0x14]]  ;;  %s338_s24 = sld [smem:[#allocation2 + $0x18]]  ;;  %v385_v17 = vld [vmem:[%s548_s1 + $0x6] sm:$0x1]  ;;  %vm173_vm0 = vcmask 0  }
  0x13   :  { %s345_s27 = sld [smem:[#allocation2 + $0x1d]]  ;;  %s347_s28 = sld [smem:[#allocation2 + $0x1]] }
  0x14   :  { %s354_s3 = sld [smem:[#allocation2 + $0x5]]  ;;  %s356_s4 = sld [smem:[#allocation2 + $0x9]] }
  0x15   :  { %v27_v3 = vstv %s25_s15  ;;  %v29_v4 = vstv %s237_s14  ;;  %s364_s7 = sld [smem:[#allocation2 + $0xd]]  ;;  %s366_s8 = sld [smem:[#allocation2 + $0x11]] }
  0x16   :  { %v28_v6 = vmul.f32 %v27_v3, %v331_v0  ;;  %v33_v7 = vstv %s238_s16  ;;  %v38_v8 = vstv %s239_s17  ;;  %s375_s11 = sld [smem:[#allocation2 + $0x15]]  ;;  %s377_s12 = sld [smem:[#allocation2 + $0x19]] }
  0x17   :  { %v34_v10 = vmul.f32 %v33_v7, %v336_v1  ;;  %v43_v11 = vstv %s322_s18  ;;  %v39_v14 = vmul.f32 %v38_v8, %v343_v2  ;;  %v48_v15 = vstv %s324_s0  ;;  %s387_s15 = sld [smem:[#allocation2 + $0x1e]]  ;;  %s389_s16 = sld [smem:[#allocation2 + $0x2]] }
  0x18   :  { %v30_v13 = vadd.f32 %v29_v4, %v28_v6  ;;  %v53_v16 = vstv %s326_s19  ;;  %v44_v18 = vmul.f32 %v43_v11, %v352_v5  ;;  %v49_v19 = vmul.f32 %v48_v15, %v362_v9  ;;  %s394_s17 = sld [smem:[#allocation2 + $0x6]]  ;;  %s396_s18 = sld [smem:[#allocation2 + $0xa]] }
  0x19   :  { %v58_v20 = vstv %s338_s24  ;;  %v54_v22 = vmul.f32 %v53_v16, %v373_v12  ;;  %v64_v23 = vstv %s347_s28  ;;  %v66_v24 = vstv %s345_s27  ;;  %s401_s1 = sld [smem:[#allocation2 + $0xe]]  ;;  %s403_s0 = sld [smem:[#allocation2 + $0x12]] }
  0x1a   :  { %v35_v21 = vadd.f32 %v34_v10, %v30_v13  ;;  %v59_v25 = vmul.f32 %v58_v20, %v385_v17  ;;  %v65_v26 = vmul.f32 %v64_v23, %v331_v0  ;;  %v69_v27 = vstv %s354_s3  ;;  %s409_s19 = sld [smem:[#allocation2 + $0x16]]  ;;  %s411_s20 = sld [smem:[#allocation2 + $0x1a]] }
  0x1b   :  { %v73_v28 = vstv %s356_s4  ;;  %v70_v30 = vmul.f32 %v69_v27, %v336_v1  ;;  %v77_v32 = vstv %s364_s7  ;;  %s416_s21 = sld [smem:[#allocation2 + $0x1f]]  ;;  %v81_v35 = vstv %s366_s8  ;;  %s421_s22 = sld [smem:[#allocation2 + $0x3]] }
  0x1c   :  { %v40_v29 = vadd.f32 %v39_v14, %v35_v21  ;;  %v74_v31 = vmul.f32 %v73_v28, %v343_v2  ;;  %v67_v33 = vadd.f32 %v66_v24, %v65_v26  ;;  %v78_v34 = vmul.f32 %v77_v32, %v352_v5  ;;  %s423_s23 = sld [smem:[#allocation2 + $0x7]]  ;;  %s428_s24 = sld [smem:[#allocation2 + $0xb]] }
  0x1d   :  { %v85_v36 = vstv %s375_s11  ;;  %v82_v38 = vmul.f32 %v81_v35, %v362_v9  ;;  %v89_v40 = vstv %s377_s12  ;;  %v95_v43 = vstv %s389_s16  ;;  %s433_s25 = sld [smem:[#allocation2 + $0xf]]  ;;  %s435_s26 = sld [smem:[#allocation2 + $0x13]] }
  0x1e   :  { %v45_v37 = vadd.f32 %v44_v18, %v40_v29  ;;  %v86_v39 = vmul.f32 %v85_v36, %v373_v12  ;;  %v71_v41 = vadd.f32 %v70_v30, %v67_v33  ;;  %v90_v42 = vmul.f32 %v89_v40, %v385_v17  ;;  %s443_s27 = sld [smem:[#allocation2 + $0x17]]  ;;  %s445_s28 = sld [smem:[#allocation2 + $0x1b]] }
  0x1f   :  { %v97_v44 = vstv %s387_s15  ;;  %v96_v46 = vmul.f32 %v95_v43, %v331_v0  ;;  %v100_v47 = vstv %s394_s17  ;;  %v104_v48 = vstv %s396_s18  ;;  %s449_s29 = sld [smem:[#allocation2 + $0x30]]  ;;  %s456_s3 = sld [smem:[#allocation2 + $0x24]] }
  0x20   :  { %v50_v45 = vadd.f32 %v49_v19, %v45_v37  ;;  %v75_v49 = vadd.f32 %v74_v31, %v71_v41  ;;  %v101_v50 = vmul.f32 %v100_v47, %v336_v1  ;;  %v105_v51 = vmul.f32 %v104_v48, %v343_v2  ;;  %s454_s30 = sld [smem:[#allocation2 + $0x20]]  ;;  %s462_s5 = sld [smem:[#allocation2 + $0x2c]] }
  0x21   :  { %v108_v52 = vstv %s401_s1  ;;  %v98_v54 = vadd.f32 %v97_v44, %v96_v46  ;;  %v112_v56 = vstv %s403_s0  ;;  %v116_v59 = vstv %s409_s19  ;;  %s460_s4 = sld [smem:[#allocation2 + $0x28]]  ;;  %s467_s6 = sld [smem:[#allocation2 + $0x31]] }
  0x22   :  { %v55_v53 = vadd.f32 %v54_v22, %v50_v45  ;;  %v109_v55 = vmul.f32 %v108_v52, %v352_v5  ;;  %v79_v57 = vadd.f32 %v78_v34, %v75_v49  ;;  %v113_v58 = vmul.f32 %v112_v56, %v362_v9  ;;  %s469_s7 = sld [smem:[#allocation2 + $0x21]]  ;;  %s475_s8 = sld [smem:[#allocation2 + $0x25]] }
  0x23   :  { %v120_v60 = vstv %s411_s20  ;;  %v102_v62 = vadd.f32 %v101_v50, %v98_v54  ;;  %v117_v63 = vmul.f32 %v116_v59, %v373_v12  ;;  %v126_v6 = vstv %s421_s22  ;;  %s477_s9 = sld [smem:[#allocation2 + $0x29]]  ;;  %s482_s10 = sld [smem:[#allocation2 + $0x2d]] }
  0x24   :  { %v60_v61 = vadd.f32 %v59_v25, %v55_v53  ;;  %v121_v3 = vmul.f32 %v120_v60, %v385_v17  ;;  %v83_v4 = vadd.f32 %v82_v38, %v79_v57  ;;  %v128_v7 = vstv %s416_s21  ;;  %s484_s11 = sld [smem:[#allocation2 + $0x22]]  ;;  %s493_s13 = sld [smem:[#allocation2 + $0x26]] }
  0x25   :  { %v131_v8 = vstv %s423_s23  ;;  %v106_v11 = vadd.f32 %v105_v51, %v102_v62  ;;  %v127_v13 = vmul.f32 %v126_v6, %v331_v0  ;;  %v135_v16 = vstv %s428_s24  ;;  %s491_s12 = sld [smem:[#allocation2 + $0x32]]  ;;  %s502_s15 = sld [smem:[#allocation2 + $0x2e]] }
  0x26   :  { %v471_v10 = vmax.f32 %v60_v61, 0.0  ;;  %v132_v14 = vmul.f32 %v131_v8, %v336_v1  ;;  %v87_v15 = vadd.f32 %v86_v39, %v83_v4  ;;  %v139_v18 = vstv %s433_s25  ;;  %s500_s14 = sld [smem:[#allocation2 + $0x2a]]  ;;  %s506_s16 = sld [smem:[#allocation2 + $0x23]] }
  0x27   :  { %v143_v19 = vstv %s435_s26  ;;  %v110_v20 = vadd.f32 %v109_v55, %v106_v11  ;;  %v129_v0 = vadd.f32 %v128_v7, %v127_v13  ;;  %v136_v1 = vmul.f32 %v135_v16, %v343_v2  ;;  %s511_s17 = sld [smem:[#allocation2 + $0x33]]  ;;  %s513_s18 = sld [smem:[#allocation2 + $0x27]] }
  0x28   :  { %v140_v21 = vmul.f32 %v139_v18, %v352_v5  ;;  %v91_v22 = vadd.f32 %v90_v42, %v87_v15  ;;  %v144_v23 = vmul.f32 %v143_v19, %v362_v9  ;;  %v147_v24 = vstv %s443_s27  ;;  %s516_s1 = sld [smem:[#allocation2 + $0x2b]]  ;;  %s518_s0 = sld [smem:[#allocation2 + $0x2f]] }
  0x29   :  { %v151_v25 = vstv %s445_s28  ;;  %v114_v26 = vadd.f32 %v113_v58, %v110_v20  ;;  %v133_v27 = vadd.f32 %v132_v14, %v129_v0  ;;  %v148_v28 = vmul.f32 %v147_v24, %v373_v12 }
  0x2a   :  { %v152_v2 = vmul.f32 %v151_v25, %v385_v17  ;;  %v92_v5 = vmax.f32 %v91_v22, 0.0  ;;  %v157_v29 = vstv %s454_s30  ;;  %v159_v30 = vstv %s449_s29 }
  0x2b   :  { %v162_v9 = vstv %s456_s3  ;;  %v118_v31 = vadd.f32 %v117_v63, %v114_v26  ;;  %v137_v32 = vadd.f32 %v136_v1, %v133_v27  ;;  %v158_v33 = vmul.f32 %v157_v29, %v471_v10 }
  0x2c   :  { %v166_v34 = vstv %s460_s4  ;;  %v163_v12 = vmul.f32 %v162_v9, %v92_v5  ;;  %v170_v17 = vstv %s462_s5  ;;  %v177_v35 = vstv %s469_s7 }
  0x2d   :  { %v179_v36 = vstv %s467_s6  ;;  %v122_v37 = vadd.f32 %v121_v3, %v118_v31  ;;  %v141_v38 = vadd.f32 %v140_v21, %v137_v32  ;;  %v160_v39 = vadd.f32 %v159_v30, %v158_v33 }
  0x2e   :  { %v178_v40 = vmul.f32 %v177_v35, %v471_v10  ;;  %v182_v41 = vstv %s475_s8  ;;  %v186_v42 = vstv %s477_s9  ;;  %v190_v43 = vstv %s482_s10 }
  0x2f   :  { %v196_v44 = vstv %s484_s11  ;;  %v123_v45 = vmax.f32 %v122_v37, 0.0  ;;  %v145_v46 = vadd.f32 %v144_v23, %v141_v38  ;;  %v164_v47 = vadd.f32 %v163_v12, %v160_v39 }
  0x30   :  { %v180_v48 = vadd.f32 %v179_v36, %v178_v40  ;;  %v183_v49 = vmul.f32 %v182_v41, %v92_v5  ;;  %v197_v50 = vmul.f32 %v196_v44, %v471_v10  ;;  %v198_v51 = vstv %s491_s12 }
  0x31   :  { %v201_v52 = vstv %s493_s13  ;;  %v149_v53 = vadd.f32 %v148_v28, %v145_v46  ;;  %v167_v54 = vmul.f32 %v166_v34, %v123_v45  ;;  %v187_v55 = vmul.f32 %v186_v42, %v123_v45 }
  0x32   :  { %v202_v56 = vmul.f32 %v201_v52, %v92_v5  ;;  %v184_v57 = vadd.f32 %v183_v49, %v180_v48  ;;  %v199_v58 = vadd.f32 %v198_v51, %v197_v50  ;;  %v205_v59 = vstv %s500_s14 }
  0x33   :  { %v209_v60 = vstv %s502_s15  ;;  %v153_v61 = vadd.f32 %v152_v2, %v149_v53  ;;  %v168_v62 = vadd.f32 %v167_v54, %v164_v47  ;;  %v206_v63 = vmul.f32 %v205_v59, %v123_v45 }
  0x34   :  { %v215_v3 = vstv %s506_s16  ;;  %v188_v4 = vadd.f32 %v187_v55, %v184_v57  ;;  %v203_v6 = vadd.f32 %v202_v56, %v199_v58  ;;  %v217_v8 = vstv %s511_s17 }
  0x35   :  { %v216_v7 = vmul.f32 %v215_v3, %v471_v10  ;;  %v154_v11 = vmax.f32 %v153_v61, 0.0  ;;  %v220_v13 = vstv %s513_s18  ;;  %v224_v14 = vstv %s516_s1 }
  0x36   :  { %v228_v15 = vstv %s518_s0  ;;  %v207_v16 = vadd.f32 %v206_v63, %v203_v6  ;;  %v221_v19 = vmul.f32 %v220_v13, %v92_v5  ;;  %v225_v20 = vmul.f32 %v224_v14, %v123_v45 }
  0x37   :  { %v218_v18 = vadd.f32 %v217_v8, %v216_v7  ;;  %v171_v0 = vmul.f32 %v170_v17, %v154_v11  ;;  %v191_v1 = vmul.f32 %v190_v43, %v154_v11  ;;  %v210_v21 = vmul.f32 %v209_v60, %v154_v11 }
  0x38   :  { %v229_v23 = vmul.f32 %v228_v15, %v154_v11 }
  0x39   :  { %v222_v22 = vadd.f32 %v221_v19, %v218_v18  ;;  %v172_v24 = vadd.f32 %v171_v0, %v168_v62  ;;  %v192_v25 = vadd.f32 %v191_v1, %v188_v4  ;;  %v211_v26 = vadd.f32 %v210_v21, %v207_v16 }
  0x3b   :  { %v226_v27 = vadd.f32 %v225_v20, %v222_v22  ;;  %174 = vst.msk [vmem:[%s549_s2] sm:$0x1] %vm173_vm0, %v172_v24  ;;  %193 = vst.msk [vmem:[%s549_s2 + $0x1] sm:$0x1] %vm173_vm0, %v192_v25 }
  0x3c   :  { %212 = vst.msk [vmem:[%s549_s2 + $0x2] sm:$0x1] %vm173_vm0, %v211_v26 }
  0x3d   :  { %v230_v10 = vadd.f32 %v229_v23, %v226_v27 }
  0x3f   :  { %231 = vst.msk [vmem:[%s549_s2 + $0x3] sm:$0x1] %vm173_vm0, %v230_v10 }
  0x40   :  { %236 = vsyncpa [#allocation3], 1 }

</bundles_post_ra>
